<compile_context>
chip_gen: v6e
topology: v6e:2x2x1
jax: 0.10.0
libtpu: 0.0.40
codegen_flags: <defaults>
</compile_context>

<pallas_src>
import jax
import jax.numpy as jnp
from jax import lax
from jax.experimental import pallas as pl
from jax.experimental.pallas import tpu as pltpu

_LANE = 128       # lane (minor) axis width
_SUBLANE = 8      # f32 sublane tile
_ROW_ALIGN = 16   # covers both f32 (8) and bf16 (16) sublane packing


def _cdiv(a, b):
    return -(-a // b)


def _round_up(x, m):
    return ((x + m - 1) // m) * m


def _device_defaults():
    """Return (num_chunks, target bytes per input block) for this device.

    2-TensorCore parts (v7x, and megacore v4/v5p) get 2 parallel chunks and
    2 MiB blocks; single-TC v5e/v6e get 1 chunk and 1 MiB blocks (~85% of
    HBM roofline per the measured tiling data, with ample VMEM headroom).
    """
    num_chunks, block_bytes = 1, 1 << 20
    try:
        dev = jax.devices()[0]
        kind = getattr(dev, "device_kind", "").lower()
        if dev.platform == "tpu" and any(s in kind for s in ("v7", "v5p", "v4")):
            num_chunks, block_bytes = 2, 2 << 20
    except Exception:
        pass
    return num_chunks, block_bytes


def _make_mape_kernel(rows, row_tile, tiles_per_chunk, need_mask):
    """Kernel accumulating sum(|t - p| / |t|) of one (row_tile, 128) tile into
    an (8, 128) accumulator living in the output block.

    Grid = (chunks, tiles_per_chunk):
      axis 0 "parallel"  -> one partial accumulator per chunk (megacore),
      axis 1 "arbitrary" -> sequential reduction; output block index is
                            constant along it, so the accumulator is resident.
    `rows`, `row_tile`, `tiles_per_chunk`, `need_mask` are trace-time ints.
    """

    def kernel(p_ref, t_ref, acc_ref):
        c = pl.program_id(0)
        k = pl.program_id(1)

        @pl.when(k == 0)
        def _init():
            acc_ref[...] = jnp.zeros_like(acc_ref)

        p = p_ref[...].astype(jnp.float32)
        t = t_ref[...].astype(jnp.float32)

        # |(t - p) / t| == |t - p| / |t|; exact divide (accuracy-sensitive and
        # fully hidden under the DMA — do NOT switch to approx reciprocal).
        term = jnp.abs(t - p) / jnp.abs(t)

        if need_mask:
            # Zero the rows that lie past the true row count: the ragged last
            # tile and any duplicate (clamped) tile contribute exactly 0.
            tid = c * tiles_per_chunk + k
            base = tid * row_tile
            row_idx = base + lax.broadcasted_iota(jnp.int32, (row_tile, _LANE), 0)
            term = jnp.where(row_idx < rows, term, 0.0)

        # Fold (row_tile, 128) -> (8, 128): layout-preserving reshape (each
        # (8,128) group is one vreg tile) + elementwise VPU adds across tiles.
        acc_ref[0] += term.reshape(row_tile // _SUBLANE, _SUBLANE, _LANE).sum(axis=0)

    return kernel


def mape_loss_pallas(predictions, targets, *, row_tile=None, num_chunks=None):
    """MAPE loss over arbitrarily-shaped (matching) predictions/targets."""
    assert predictions.shape == targets.shape, "shape mismatch"
    total = predictions.size
    assert total > 0

    p = predictions.reshape(-1)   # free (contiguous, row-major)
    t = targets.reshape(-1)

    # --- split off the (< 128 element) ragged remainder, computed in jnp ----
    main = (total // _LANE) * _LANE
    tail = total - main

    tail_sum = None
    if tail:
        pt = p[main:].astype(jnp.float32)
        tt = t[main:].astype(jnp.float32)
        tail_sum = jnp.sum(jnp.abs(tt - pt) / jnp.abs(tt))

    if main == 0:                       # tiny input: no kernel needed
        return tail_sum / jnp.float32(total)

    # --- tiling decisions (all Python ints, trace-time) ---------------------
    auto_chunks, block_bytes = _device_defaults()
    if num_chunks is None:
        num_chunks = auto_chunks
    num_chunks = max(1, int(num_chunks))

    itemsize = jnp.dtype(predictions.dtype).itemsize
    if row_tile is None:
        # ~1-2 MiB of input *bytes* per block, regardless of dtype.
        row_tile = block_bytes // (_LANE * itemsize)
    row_tile = max(_ROW_ALIGN, min(int(row_tile), 8192))

    rows = main // _LANE

    # Never use a bigger tile than one chunk actually needs (no over-padding).
    row_tile_eff = min(row_tile, _round_up(_cdiv(rows, num_chunks), _ROW_ALIGN))
    row_tile_eff = _round_up(row_tile_eff, _ROW_ALIGN)

    n_tiles = _cdiv(rows, row_tile_eff)
    chunks = max(1, min(num_chunks, n_tiles))        # no empty chunks
    tiles_per_chunk = _cdiv(n_tiles, chunks)

    covered_rows = chunks * tiles_per_chunk * row_tile_eff
    need_mask = covered_rows != rows                  # ragged / duplicate tiles
    need_clamp = chunks * tiles_per_chunk > n_tiles   # grid rounding overshoot

    # --- kernel inputs: no jnp.pad; at most a prefix slice in the rare ------
    # --- ragged case (total % 128 != 0). -------------------------------------
    if tail:
        p_main, t_main = p[:main], t[:main]
    else:
        p_main, t_main = p, t
    p2 = p_main.reshape(rows, _LANE)
    t2 = t_main.reshape(rows, _LANE)

    block = (row_tile_eff, _LANE)

    if need_clamp:
        last = n_tiles - 1

        def in_idx(c, k):
            # Duplicate grid steps re-read the last valid tile; the in-kernel
            # row mask zeroes their contribution.
            return (jnp.minimum(c * tiles_per_chunk + k, last), 0)
    else:
        def in_idx(c, k):
            return (c * tiles_per_chunk + k, 0)

    kernel = _make_mape_kernel(rows, row_tile_eff, tiles_per_chunk, need_mask)

    cost = pl.CostEstimate(
        flops=6 * main,
        transcendentals=main,                      # the divide
        bytes_accessed=2 * main * itemsize + chunks * _SUBLANE * _LANE * 4,
    )

    partials = pl.pallas_call(
        kernel,
        out_shape=jax.ShapeDtypeStruct((chunks, _SUBLANE, _LANE), jnp.float32),
        grid_spec=pltpu.PrefetchScalarGridSpec(
            num_scalar_prefetch=0,
            grid=(chunks, tiles_per_chunk),
            in_specs=[
                pl.BlockSpec(block, in_idx),
                pl.BlockSpec(block, in_idx),
            ],
            # Output block index constant along the reduction axis -> resident
            # accumulator; lane-dense (8,128) block -> unmasked stores.
            out_specs=pl.BlockSpec((1, _SUBLANE, _LANE), lambda c, k: (c, 0, 0)),
        ),
        compiler_params=pltpu.CompilerParams(
            dimension_semantics=("parallel", "arbitrary"),
        ),
        cost_estimate=cost,
    )(p2, t2)

    # Tiny wrapper-side cross-lane reduce of the per-chunk partial sums + mean.
    result = jnp.sum(partials)
    if tail:
        result = result + tail_sum
    return result / jnp.float32(total)


def mape_loss_ref(predictions, targets):
    return jnp.mean(jnp.abs((targets - predictions) / targets))


if __name__ == "__main__":
    key = jax.random.PRNGKey(0)

    def check(p, t, **kw):
        loss = jax.block_until_ready(mape_loss_pallas(p, t, **kw))
        ref = jax.block_until_ready(mape_loss_ref(p, t))
        assert jnp.allclose(loss, ref, rtol=1e-5, atol=1e-5), (loss, ref, kw)

    # Test 1: NCHW-like tensor (batch=2, channels=4, spatial=16x16); size is a
    # multiple of 128, so the zero-copy fast path is taken.
    kp, kt, key = jax.random.split(key, 3)
    shape = (2, 4, 16, 16)
    predictions = jax.random.normal(kp, shape, dtype=jnp.float32)
    targets = jax.random.uniform(kt, shape, dtype=jnp.float32,
                                 minval=0.5, maxval=2.0)   # keep away from 0
    check(predictions, targets)

    # Test 2: ragged size (not a multiple of 128) -> in-kernel row mask on a
    # partial block plus jnp tail for the last <128 elements.
    kp, kt, key = jax.random.split(key, 3)
    shape2 = (3, 5, 7, 11)
    p2 = jax.random.normal(kp, shape2, dtype=jnp.float32)
    t2 = jax.random.uniform(kt, shape2, dtype=jnp.float32, minval=0.5, maxval=2.0)
    check(p2, t2)

    # Test 3: multi-tile / multi-chunk path with a forced small tile
    # (production default stays at ~1-2 MiB blocks).
    kp, kt, key = jax.random.split(key, 3)
    shape3 = (4, 4, 32, 32)
    p3 = jax.random.normal(kp, shape3, dtype=jnp.float32)
    t3 = jax.random.uniform(kt, shape3, dtype=jnp.float32, minval=0.5, maxval=2.0)
    check(p3, t3, row_tile=16, num_chunks=2)

    # Test 4: odd tile count with 2 chunks -> exercises the clamped index_map
    # (duplicate tile) + mask path.
    kp, kt, key = jax.random.split(key, 3)
    shape4 = (6, 32, 32)   # 6144 elems -> 48 rows -> 3 tiles of 16, 2 chunks
    p4 = jax.random.normal(kp, shape4, dtype=jnp.float32)
    t4 = jax.random.uniform(kt, shape4, dtype=jnp.float32, minval=0.5, maxval=2.0)
    check(p4, t4, row_tile=16, num_chunks=2)

    print("KERNEL_OK")
</pallas_src>

<mosaic_0001>
module attributes {stable_mosaic.version = 11 : i64} {
  func.func @kernel(%arg0: i32, %arg1: i32, %arg2: memref<16x128xf32, #tpu.memory_space<vmem>>, %arg3: memref<16x128xf32, #tpu.memory_space<vmem>>, %arg4: memref<1x8x128xf32, #tpu.memory_space<vmem>>) attributes {dimension_semantics = [#tpu.dimension_semantics<parallel>, #tpu.dimension_semantics<arbitrary>], iteration_bounds = array<i64: 1, 1>, scalar_prefetch = 0 : i64, scratch_operands = 0 : i64, tpu.core_type = #tpu.core_type<tc>, window_params = [{transform_indices = @transform_0, window_bounds = array<i64: 16, 128>}, {transform_indices = @transform_1, window_bounds = array<i64: 16, 128>}, {transform_indices = @transform_2, window_bounds = array<i64: 1, 8, 128>}]} {
    %c0_i32 = arith.constant 0 : i32
    %0 = arith.cmpi eq, %arg1, %c0_i32 : i32
    %1 = arith.extui %0 : i1 to i32
    %c0_i32_0 = arith.constant 0 : i32
    %2 = arith.cmpi ne, %1, %c0_i32_0 : i32
    scf.if %2 {
      %cst_10 = arith.constant 0.000000e+00 : f32
      %17 = vector.broadcast %cst_10 : f32 to vector<1x8x128xf32>
      %c0_11 = arith.constant 0 : index
      %c0_12 = arith.constant 0 : index
      %c0_13 = arith.constant 0 : index
      %18 = vector.load %arg4[%c0_11, %c0_12, %c0_13] : memref<1x8x128xf32, #tpu.memory_space<vmem>>, vector<1x8x128xf32>
      tpu.vector_store %arg4[%c0_11, %c0_12, %c0_13], %17 {strides = array<i32>} : memref<1x8x128xf32, #tpu.memory_space<vmem>>, vector<1x8x128xf32>,
    } else {
    }
    %c0 = arith.constant 0 : index
    %c0_1 = arith.constant 0 : index
    %3 = vector.load %arg2[%c0, %c0_1] : memref<16x128xf32, #tpu.memory_space<vmem>>, vector<16x128xf32>
    %c0_2 = arith.constant 0 : index
    %c0_3 = arith.constant 0 : index
    %4 = vector.load %arg3[%c0_2, %c0_3] : memref<16x128xf32, #tpu.memory_space<vmem>>, vector<16x128xf32>
    %5 = arith.subf %4, %3 : vector<16x128xf32>
    %6 = math.absf %5 : vector<16x128xf32>
    %7 = math.absf %4 : vector<16x128xf32>
    %8 = arith.divf %6, %7 : vector<16x128xf32>
    %c0_4 = arith.constant 0 : index
    %c0_5 = arith.constant 0 : index
    %c0_6 = arith.constant 0 : index
    %9 = vector.load %arg4[%c0_4, %c0_5, %c0_6] : memref<1x8x128xf32, #tpu.memory_space<vmem>>, vector<1x8x128xf32>
    %10 = vector.shape_cast %9 : vector<1x8x128xf32> to vector<8x128xf32>
    %11 = vector.shape_cast %8 : vector<16x128xf32> to vector<2x8x128xf32>
    %cst = arith.constant dense<0.000000e+00> : vector<8x128xf32>
    %12 = vector.multi_reduction <add>, %11, %cst [0] : vector<2x8x128xf32> to vector<8x128xf32>
    %13 = arith.addf %10, %12 : vector<8x128xf32>
    %c0_7 = arith.constant 0 : index
    %c0_8 = arith.constant 0 : index
    %c0_9 = arith.constant 0 : index
    %14 = vector.load %arg4[%c0_7, %c0_8, %c0_9] : memref<1x8x128xf32, #tpu.memory_space<vmem>>, vector<1x8x128xf32>
    %15 = vector.shape_cast %14 : vector<1x8x128xf32> to vector<8x128xf32>
    %16 = vector.shape_cast %13 : vector<8x128xf32> to vector<1x8x128xf32>
    tpu.vector_store %arg4[%c0_7, %c0_8, %c0_9], %16 {strides = array<i32>} : memref<1x8x128xf32, #tpu.memory_space<vmem>>, vector<1x8x128xf32>,
    return
  }
  func.func @transform_0(%arg0: i32, %arg1: i32) -> (i32, i32) {
    %c1_i32 = arith.constant 1 : i32
    %0 = arith.muli %arg0, %c1_i32 : i32
    %1 = arith.addi %0, %arg1 : i32
    %c0_i32 = arith.constant 0 : i32
    %c0_i32_0 = arith.constant 0 : i32
    return %1, %c0_i32 : i32, i32
  }
  func.func @transform_1(%arg0: i32, %arg1: i32) -> (i32, i32) {
    %c1_i32 = arith.constant 1 : i32
    %0 = arith.muli %arg0, %c1_i32 : i32
    %1 = arith.addi %0, %arg1 : i32
    %c0_i32 = arith.constant 0 : i32
    %c0_i32_0 = arith.constant 0 : i32
    return %1, %c0_i32 : i32, i32
  }
  func.func @transform_2(%arg0: i32, %arg1: i32) -> (i32, i32, i32) {
    %c0_i32 = arith.constant 0 : i32
    %c0_i32_0 = arith.constant 0 : i32
    %c0_i32_1 = arith.constant 0 : i32
    return %arg0, %c0_i32, %c0_i32_0 : i32, i32, i32
  }
}

</mosaic_0001>

<bundles_post_ra>
// kernel: tpu_custom_call.1
= control target key start
LH: loop header
LB: loop body
LE: loop exit
PB: predicated region body
PF: predicated region fallthrough
CT: control target
= control target key end

     0   :  { %7 = vsyncpa [#allocation3], 0  ;;  %s196_s0 = inlined_call_operand.hbm [shape: f32[16,128], index: 0, kind: input, shape index: {}]   ;;  %s197_s1 = inlined_call_operand.hbm [shape: f32[16,128], index: 1, kind: input, shape index: {}]   ;;  %s198_s2 = inlined_call_operand.hbm [shape: f32[1,8,128], index: 2, kind: output, shape index: {}]  }
   0x1   :  { %8 = vsyncpa [#allocation6], 0 }
   0x2   :  { %9 = vsyncpa [#allocation4], 0  ;;  %s167_s9 = smov [#allocation2]  }
   0x3   :  { %s19_s10 = sshll.u32 %s167_s9, 4  ;;  %s20_s10 = int_to_ptr.vmem [resolvable:$true] %s19_s10 }
   0x4   :  { %s109_s11 = scalar_lea.vmem %s20_s10, 256  ;;  %p114_p1 = scmp.lt.s32.totalorder %s20_s10, %s20_s10 }
   0x5   :  { %p110_p0 = scmp.ne.s32.totalorder %s20_s10, %s109_s11  ;;  %p115_p2 = scmp.lt.s32.totalorder %s109_s11, %s109_s11 }
   0x7   :  { %p116_p3 = por %p115_p2, %p114_p1 }
   0x9   :  { %p117_p4 = pnand %p116_p3, %p110_p0 }
   0xb   :  { %120 = shalt.err (!%p117_p4)
}
   0xc   :  { %s168_s12 = smov 128   ;;  %s169_s13 = smov 8  }
   0xd   :  { %25 = dma.hbm_to_vmem [thread:$0]  %s196_s0, 256, %s20_s10, [#allocation3], %s168_s12, %s168_s12, %s169_s13  }
   0xe   :  { %s170_s16 = smov [#allocation5]  }
   0xf   :  { %s35_s17 = sshll.u32 %s170_s16, 4  ;;  %s36_s17 = int_to_ptr.vmem [resolvable:$true] %s35_s17 }
  0x10   :  { %s129_s18 = scalar_lea.vmem %s36_s17, 256  ;;  %p134_p6 = scmp.lt.s32.totalorder %s36_s17, %s36_s17 }
  0x11   :  { %p130_p5 = scmp.ne.s32.totalorder %s36_s17, %s129_s18  ;;  %p135_p7 = scmp.lt.s32.totalorder %s129_s18, %s129_s18 }
  0x13   :  { %p136_p8 = por %p135_p7, %p134_p6 }
  0x15   :  { %p137_p9 = pnand %p136_p8, %p130_p5 }
  0x17   :  { %140 = shalt.err (!%p137_p9)
}
  0x18   :  { %41 = dma.hbm_to_vmem [thread:$0]  %s197_s1, 256, %s36_s17, [#allocation6], %s168_s12, %s168_s12, %s169_s13  }
  0x19   :  { %161 = dma.done.wait [#allocation3], 256  }
  0x1a   :  { %162 = vsyncadd [#allocation3], 4294967040 }
  0x1b   :  { %163 = dma.done.wait [#allocation6], 256  }
  0x1c   :  { %164 = vsyncadd [#allocation6], 4294967040  ;;  %v59_v0 = vld [vmem:[#allocation5] sm:$0xff]  ;;  %v60_v1 = vld [vmem:[#allocation5 + $0x8] sm:$0xff]  ;;  %s171_s0 = smov [#allocation7]  }
  0x1d   :  { %v65_v2 = vand.u32 2147483647, %v59_v0  ;;  %v66_v3 = vand.u32 2147483647, %v60_v1  ;;  %v57_v4 = vld [vmem:[#allocation2] sm:$0xff]  ;;  %v58_v5 = vld [vmem:[#allocation2 + $0x8] sm:$0xff] }
  0x1e   :  { %v61_v6 = vsub.f32 %v59_v0, %v57_v4  ;;  %v62_v7 = vsub.f32 %v60_v1, %v58_v5  ;;  %s81_s1 = sshll.u32 %s171_s0, 4  ;;  %s82_s1 = int_to_ptr.vmem [resolvable:$true] %s81_s1 }
  0x1f   :  { %97 = vrcp.f32 %v65_v2  ;;  %s141_s21 = scalar_lea.vmem %s82_s1, 128  ;;  %p146_p11 = scmp.lt.s32.totalorder %s82_s1, %s82_s1 }
  0x20   :  { %99 = vrcp.f32 %v66_v3  ;;  %v63_v8 = vand.u32 2147483647, %v61_v6  ;;  %v64_v9 = vand.u32 2147483647, %v62_v7  ;;  %p142_p10 = scmp.ne.s32.totalorder %s82_s1, %s141_s21  ;;  %p147_p12 = scmp.lt.s32.totalorder %s141_s21, %s141_s21 }
  0x22   :  { %p148_p13 = por %p147_p12, %p146_p11 }
  0x24   :  { %p149_p0 = pnand %p148_p13, %p142_p10 }
  0x2c   :  { %v98_v10 = vpop.eup %97 }
  0x2d   :  { %v100_v11 = vpop.eup %99  ;;  %v68_v12 = vmul.f32 %v98_v10, %v63_v8 }
  0x2e   :  { %v70_v13 = vmul.f32 %v100_v11, %v64_v9 }
  0x30   :  { %v72_v14 = vadd.f32 %v70_v13, %v68_v12 }
  0x32   :  { %74 = vst [vmem:[#allocation7] sm:$0xff] %v72_v14 }
  0x33   :  { %152 = shalt.err (!%p149_p0)
}
  0x34   :  { %84 = dma.vmem_to_hbm [thread:$0]  %s82_s1, 128, %s198_s2, [#allocation4]  }
  0x35   :  { %165 = dma.done.wait [#allocation4], 128  }
  0x36   :  { %166 = vsyncadd [#allocation4], 4294967168 }
  0x37   :  { %88 = vsyncpa [#allocation3], 1 }
  0x38   :  { %89 = vsyncpa [#allocation6], 1 }
  0x39   :  { %90 = vsyncpa [#allocation4], 1 }

</bundles_post_ra>
